<compile_context>
chip_gen: v7x
topology: tpu7x:2x2x1
jax: 0.10.0
libtpu: 0.0.40
codegen_flags: <defaults>
</compile_context>

<pallas_src>
import numpy as np
import jax
import jax.numpy as jnp
from jax.experimental import pallas as pl
from jax.experimental.pallas import tpu as pltpu


def policy_forward_kernel(x_ref, w1_ref, b1_ref, w2_ref, b2_ref,
                          w3_ref, b3_ref, out_ref):
    f32 = jnp.float32
    bf16 = jnp.bfloat16
    # Layer 1: (bm, F) @ (F, H1) + b1, tanh.  bf16 operands, f32 accumulation;
    # tanh runs on the EUP in f32 (v5e has no bf16 EUP path).
    h = jnp.tanh(jnp.dot(x_ref[...], w1_ref[...], preferred_element_type=f32)
                 + b1_ref[...])
    # Layer 2: (bm, H1) @ (H1, H2) + b2, tanh
    h = jnp.tanh(jnp.dot(h.astype(bf16), w2_ref[...],
                         preferred_element_type=f32) + b2_ref[...])
    # Output layer + outer tanh of forward(): (bm, H2) @ (H2, A) + b3
    out_ref[...] = jnp.tanh(
        jnp.dot(h.astype(bf16), w3_ref[...], preferred_element_type=f32)
        + b3_ref[...])


def _round_up(x, m):
    return ((x + m - 1) // m) * m


def state_independent_policy_forward(states, params, *, bm=None):
    """states: (B, F) f32 batch of observations -> (B, A) tanh-squashed actions."""
    B, F = states.shape
    H1 = params["w1"].shape[1]
    H2 = params["w2"].shape[1]
    A = params["w3"].shape[1]

    # Batch tile: as large as reasonable (default 1024 rows) to amortize the
    # per-grid-step overhead, but never more than ~half the batch so the
    # "parallel" grid axis keeps >= 2 steps (both v7x TensorCores busy).
    if bm is None:
        bm = 1024
    bm = max(8, _round_up(bm, 8))
    bm = min(bm, max(8, _round_up(pl.cdiv(B, 2), 8)))

    # Pad the batch to a multiple of bm (zero rows are computed then discarded).
    Bp = _round_up(B, bm)
    x = states.astype(jnp.bfloat16)
    if Bp != B:
        x = jnp.pad(x, ((0, Bp - B), (0, 0)))

    def resident(shape):
        # Weights/biases: one full-extent block, identical for every grid
        # step -> single-buffered VMEM residency is enough.
        return pl.BlockSpec(shape, lambda i: (0, 0),
                            pipeline_mode=pl.Buffered(1))

    out = pl.pallas_call(
        policy_forward_kernel,
        out_shape=jax.ShapeDtypeStruct((Bp, A), jnp.float32),
        grid=(Bp // bm,),
        in_specs=[
            pl.BlockSpec((bm, F), lambda i: (i, 0)),   # states, tiled over batch
            resident((F, H1)), resident((1, H1)),
            resident((H1, H2)), resident((1, H2)),
            resident((H2, A)), resident((1, A)),
        ],
        out_specs=pl.BlockSpec((bm, A), lambda i: (i, 0)),
        compiler_params=pltpu.CompilerParams(
            dimension_semantics=("parallel",)),
    )(x,
      params["w1"].astype(jnp.bfloat16), params["b1"],
      params["w2"].astype(jnp.bfloat16), params["b2"],
      params["w3"].astype(jnp.bfloat16), params["b3"])
    return out[:B]


def init_params(key, F, H1, H2, A):
    """PyTorch-default Linear init, stored as (in_features, out_features)."""
    ks = jax.random.split(key, 3)

    def lin(k, fan_in, fan_out):
        k1, k2 = jax.random.split(k)
        bound = 1.0 / np.sqrt(fan_in)
        w = jax.random.uniform(k1, (fan_in, fan_out), jnp.float32, -bound, bound)
        b = jax.random.uniform(k2, (1, fan_out), jnp.float32, -bound, bound)
        return w, b

    w1, b1 = lin(ks[0], F, H1)
    w2, b2 = lin(ks[1], H1, H2)
    w3, b3 = lin(ks[2], H2, A)
    # log_stds = zeros(1, A) exists in the module but forward() never reads it.
    return dict(w1=w1, b1=b1, w2=w2, b2=b2, w3=w3, b3=b3)


def reference_forward(x, p):
    h = np.tanh(x @ p["w1"] + p["b1"])
    h = np.tanh(h @ p["w2"] + p["b2"])
    return np.tanh(h @ p["w3"] + p["b3"])


if __name__ == "__main__":
    # Small shapes consistent with the module: state_dim=16,
    # hidden_units=(64, 64), action_dim=2, batch=256.
    B, F, H1, H2, A = 256, 16, 64, 64, 2

    key = jax.random.PRNGKey(0)
    kx, kp = jax.random.split(key)
    x = jax.random.normal(kx, (B, F), jnp.float32)
    params = init_params(kp, F, H1, H2, A)

    out = state_independent_policy_forward(x, params)
    out = jax.block_until_ready(out)
    assert out.shape == (B, A)

    # Numerical check against a pure-numpy f32 reference of the torch
    # forward().  bf16 MXU operands => loosened tolerance.
    np_params = jax.tree_util.tree_map(np.asarray, params)
    ref = reference_forward(np.asarray(x), np_params)
    err = np.max(np.abs(np.asarray(out) - ref))
    assert np.allclose(np.asarray(out), ref, atol=1e-2), err

    # Also exercise a batch that is NOT a multiple of the tile (padding path).
    x_odd = x[:100]
    out_odd = jax.block_until_ready(
        state_independent_policy_forward(x_odd, params))
    assert out_odd.shape == (100, A)
    assert np.allclose(np.asarray(out_odd), ref[:100], atol=1e-2)

    print("KERNEL_OK")
</pallas_src>

<mosaic_0001>
module attributes {stable_mosaic.version = 11 : i64} {
  func.func @policy_forward_kernel(%arg0: i32, %arg1: memref<128x16xbf16, #tpu.memory_space<vmem>>, %arg2: memref<16x64xbf16, #tpu.memory_space<vmem>>, %arg3: memref<1x64xf32, #tpu.memory_space<vmem>>, %arg4: memref<64x64xbf16, #tpu.memory_space<vmem>>, %arg5: memref<1x64xf32, #tpu.memory_space<vmem>>, %arg6: memref<64x2xbf16, #tpu.memory_space<vmem>>, %arg7: memref<1x2xf32, #tpu.memory_space<vmem>>, %arg8: memref<128x2xf32, #tpu.memory_space<vmem>>) attributes {dimension_semantics = [#tpu.dimension_semantics<parallel>], iteration_bounds = array<i64: 2>, scalar_prefetch = 0 : i64, scratch_operands = 0 : i64, tpu.core_type = #tpu.core_type<tc>, window_params = [{transform_indices = @transform_0, window_bounds = array<i64: 128, 16>}, {pipeline_mode = #tpu.pipeline_mode<synchronous>, transform_indices = @transform_1, window_bounds = array<i64: 16, 64>}, {pipeline_mode = #tpu.pipeline_mode<synchronous>, transform_indices = @transform_2, window_bounds = array<i64: 1, 64>}, {pipeline_mode = #tpu.pipeline_mode<synchronous>, transform_indices = @transform_3, window_bounds = array<i64: 64, 64>}, {pipeline_mode = #tpu.pipeline_mode<synchronous>, transform_indices = @transform_4, window_bounds = array<i64: 1, 64>}, {pipeline_mode = #tpu.pipeline_mode<synchronous>, transform_indices = @transform_5, window_bounds = array<i64: 64, 2>}, {pipeline_mode = #tpu.pipeline_mode<synchronous>, transform_indices = @transform_6, window_bounds = array<i64: 1, 2>}, {transform_indices = @transform_7, window_bounds = array<i64: 128, 2>}]} {
    %c0 = arith.constant 0 : index
    %c0_0 = arith.constant 0 : index
    %0 = vector.load %arg1[%c0, %c0_0] : memref<128x16xbf16, #tpu.memory_space<vmem>>, vector<128x16xbf16>
    %c0_1 = arith.constant 0 : index
    %c0_2 = arith.constant 0 : index
    %1 = vector.load %arg2[%c0_1, %c0_2] : memref<16x64xbf16, #tpu.memory_space<vmem>>, vector<16x64xbf16>
    %cst = arith.constant dense<0.000000e+00> : vector<128x64xf32>
    %2 = tpu.matmul %0, %1, %cst {dimension_numbers = #tpu.dot_dimension_numbers<[1], [0], [0], [1], [0, 0, 1, 1], [], []>} : vector<128x16xbf16>, vector<16x64xbf16>, vector<128x64xf32> -> vector<128x64xf32>
    %c0_3 = arith.constant 0 : index
    %c0_4 = arith.constant 0 : index
    %3 = vector.load %arg3[%c0_3, %c0_4] : memref<1x64xf32, #tpu.memory_space<vmem>>, vector<1x64xf32>
    %4 = vector.broadcast %3 : vector<1x64xf32> to vector<128x64xf32>
    %5 = arith.addf %2, %4 : vector<128x64xf32>
    %6 = math.tanh %5 : vector<128x64xf32>
    %7 = arith.truncf %6 : vector<128x64xf32> to vector<128x64xbf16>
    %c0_5 = arith.constant 0 : index
    %c0_6 = arith.constant 0 : index
    %8 = vector.load %arg4[%c0_5, %c0_6] : memref<64x64xbf16, #tpu.memory_space<vmem>>, vector<64x64xbf16>
    %cst_7 = arith.constant dense<0.000000e+00> : vector<128x64xf32>
    %9 = tpu.matmul %7, %8, %cst_7 {dimension_numbers = #tpu.dot_dimension_numbers<[1], [0], [0], [1], [0, 0, 1, 1], [], []>} : vector<128x64xbf16>, vector<64x64xbf16>, vector<128x64xf32> -> vector<128x64xf32>
    %c0_8 = arith.constant 0 : index
    %c0_9 = arith.constant 0 : index
    %10 = vector.load %arg5[%c0_8, %c0_9] : memref<1x64xf32, #tpu.memory_space<vmem>>, vector<1x64xf32>
    %11 = vector.broadcast %10 : vector<1x64xf32> to vector<128x64xf32>
    %12 = arith.addf %9, %11 : vector<128x64xf32>
    %13 = math.tanh %12 : vector<128x64xf32>
    %14 = arith.truncf %13 : vector<128x64xf32> to vector<128x64xbf16>
    %c0_10 = arith.constant 0 : index
    %c0_11 = arith.constant 0 : index
    %15 = vector.load %arg6[%c0_10, %c0_11] : memref<64x2xbf16, #tpu.memory_space<vmem>>, vector<64x2xbf16>
    %cst_12 = arith.constant dense<0.000000e+00> : vector<128x2xf32>
    %16 = tpu.matmul %14, %15, %cst_12 {dimension_numbers = #tpu.dot_dimension_numbers<[1], [0], [0], [1], [0, 0, 1, 1], [], []>} : vector<128x64xbf16>, vector<64x2xbf16>, vector<128x2xf32> -> vector<128x2xf32>
    %c0_13 = arith.constant 0 : index
    %c0_14 = arith.constant 0 : index
    %17 = vector.load %arg7[%c0_13, %c0_14] : memref<1x2xf32, #tpu.memory_space<vmem>>, vector<1x2xf32>
    %18 = vector.broadcast %17 : vector<1x2xf32> to vector<128x2xf32>
    %19 = arith.addf %16, %18 : vector<128x2xf32>
    %20 = math.tanh %19 : vector<128x2xf32>
    %c0_15 = arith.constant 0 : index
    %c0_16 = arith.constant 0 : index
    %21 = vector.load %arg8[%c0_15, %c0_16] : memref<128x2xf32, #tpu.memory_space<vmem>>, vector<128x2xf32>
    tpu.vector_store %arg8[%c0_15, %c0_16], %20 {strides = array<i32>} : memref<128x2xf32, #tpu.memory_space<vmem>>, vector<128x2xf32>,
    return
  }
  func.func @transform_0(%arg0: i32) -> (i32, i32) {
    %c0_i32 = arith.constant 0 : i32
    %c0_i32_0 = arith.constant 0 : i32
    return %arg0, %c0_i32 : i32, i32
  }
  func.func @transform_1(%arg0: i32) -> (i32, i32) {
    %c0_i32 = arith.constant 0 : i32
    %c0_i32_0 = arith.constant 0 : i32
    %c0_i32_1 = arith.constant 0 : i32
    return %c0_i32, %c0_i32_0 : i32, i32
  }
  func.func @transform_2(%arg0: i32) -> (i32, i32) {
    %c0_i32 = arith.constant 0 : i32
    %c0_i32_0 = arith.constant 0 : i32
    %c0_i32_1 = arith.constant 0 : i32
    return %c0_i32, %c0_i32_0 : i32, i32
  }
  func.func @transform_3(%arg0: i32) -> (i32, i32) {
    %c0_i32 = arith.constant 0 : i32
    %c0_i32_0 = arith.constant 0 : i32
    %c0_i32_1 = arith.constant 0 : i32
    return %c0_i32, %c0_i32_0 : i32, i32
  }
  func.func @transform_4(%arg0: i32) -> (i32, i32) {
    %c0_i32 = arith.constant 0 : i32
    %c0_i32_0 = arith.constant 0 : i32
    %c0_i32_1 = arith.constant 0 : i32
    return %c0_i32, %c0_i32_0 : i32, i32
  }
  func.func @transform_5(%arg0: i32) -> (i32, i32) {
    %c0_i32 = arith.constant 0 : i32
    %c0_i32_0 = arith.constant 0 : i32
    %c0_i32_1 = arith.constant 0 : i32
    return %c0_i32, %c0_i32_0 : i32, i32
  }
  func.func @transform_6(%arg0: i32) -> (i32, i32) {
    %c0_i32 = arith.constant 0 : i32
    %c0_i32_0 = arith.constant 0 : i32
    %c0_i32_1 = arith.constant 0 : i32
    return %c0_i32, %c0_i32_0 : i32, i32
  }
  func.func @transform_7(%arg0: i32) -> (i32, i32) {
    %c0_i32 = arith.constant 0 : i32
    %c0_i32_0 = arith.constant 0 : i32
    return %arg0, %c0_i32 : i32, i32
  }
}

</mosaic_0001>

<bundles_post_ra>
// kernel: tpu_custom_call.1
= control target key start
LH: loop header
LB: loop body
LE: loop exit
PB: predicated region body
PF: predicated region fallthrough
CT: control target
= control target key end

     0   :  { %s1259_s24 = smov 0   ;;  %s1392_s0 = inlined_call_operand.vmem [shape: bf16[256,16], index: 0, kind: input, shape index: {}]   ;;  %s1393_s1 = inlined_call_operand.vmem [shape: bf16[16,64], index: 1, kind: input, shape index: {}]   ;;  %s1394_s2 = inlined_call_operand.vmem [shape: f32[1,64], index: 2, kind: input, shape index: {}]   ;;  %s1395_s3 = inlined_call_operand.vmem [shape: bf16[64,64], index: 3, kind: input, shape index: {}]   ;;  %s1396_s4 = inlined_call_operand.vmem [shape: f32[1,64], index: 4, kind: input, shape index: {}]   ;;  %s1397_s5 = inlined_call_operand.vmem [shape: bf16[64,2], index: 5, kind: input, shape index: {}]   ;;  %s1398_s6 = inlined_call_operand.vmem [shape: f32[1,2], index: 6, kind: input, shape index: {}]   ;;  %s1399_s7 = inlined_call_operand.vmem [shape: f32[256,2], index: 7, kind: output, shape index: {}]  }
   0x1 LB: > { %s934_s25 = sadd.s32 4294967295, %s1217_s24   ;;  %p938_p0 = scmp.ge.s32.totalorder %s1217_s24, 1  ;;  %s1217_s24 = sphi %s1259_s24, %s17_s24  }
   0x2   : > { %p238_p1 = scmp.lt.s32.totalorder %s1217_s24, 3 }
   0x4   : > { %p239_p2 = pnand %p938_p0, %p238_p1 }
   0x5   : > { %v1098_v0 = vld [vmem:[%s1393_s1] sm:$0xff] (!%p239_p2)   ;;  %s939_s28 = sshll.u32 (!%p239_p2), %s934_s25, 4  ;;  %vm354_vm0 = vcmask (!%p239_p2), 130048   ;;  %v1108_v10 = vld [vmem:[%s1395_s3 + $0x8] sm:$0xff] (!%p239_p2)   ;;  %v1109_v11 = vld [vmem:[%s1395_s3 + $0x10] sm:$0xff] (!%p239_p2)   ;;  %vm539_vm1 = vcmask (!%p239_p2), 523264  }
   0x6   : > { %242 = sbr.rel (%p239_p2) target bundleno = 733 (0x2dd), region = 48  ;;  %p271_p3 = scmp.lt.s32.totalorder (!%p239_p2), %s939_s28, 31  ;;  %1022 = vmatprep.subr.bf16.mxu0 (!%p239_p2), %v1098_v0  ;;  %1088 = vmatprep.subr.bf16.mxu1 (!%p239_p2), %v1098_v0  ;;  %v1107_v9 = vld [vmem:[%s1395_s3] sm:$0xff] (!%p239_p2)   ;;  %v1110_v12 = vld [vmem:[%s1395_s3 + $0x18] sm:$0xff] (!%p239_p2)   ;;  %vm861_vm2 = vcmask (!%p239_p2), 15360  }
   0x7   : > { %1023 = vmatpush3.bf16.msra.mxu0 (!%p239_p2), %v1098_v0  ;;  %1089 = vmatpush3.bf16.msra.mxu1 (!%p239_p2), %v1098_v0  ;;  %v943_v13 = vld [vmem:[%s1394_s2] ss:$0 sm:$0xff] (!%p239_p2) }
   0x8   : > { %1040 = vmatprep.subr.bf16.mxu1 (!%p239_p2), %v1107_v9 }
   0xd   : > { %s1401_s28 = smov (!%p271_p3, %s939_s28), 31 }
   0xe   : > { %s940_s29 = sshll.u32 %s1401_s28, 2  ;;  %s942_s11 = sshll.u32 %s1401_s28, 3 }
   0xf   : > { %s274_s9 = scalar_lea.vmem %s1392_s0, %s940_s29  ;;  %s1345_s14 = scalar_lea.vmem %s1399_s7, %s942_s11 }
  0x10   : > { %v1099_v1 = vld [vmem:[%s274_s9] sm:$0xff]   ;;  %v1100_v2 = vld [vmem:[%s274_s9 + $0x8] sm:$0xff]   ;;  %v1101_v3 = vld [vmem:[%s274_s9 + $0x10] sm:$0xff]  }
  0x11   : > { %1024 = vmatprep.mubr.msk.bf16.mxu0 %vm354_vm0, %v1099_v1  ;;  %v1103_v4 = vld [vmem:[%s274_s9 + $0x20] sm:$0xff]   ;;  %v1104_v5 = vld [vmem:[%s274_s9 + $0x28] sm:$0xff]   ;;  %v1105_v6 = vld [vmem:[%s274_s9 + $0x30] sm:$0xff]  }
  0x12   : > { %1025 = vmatmul.mubr.msk.bf16.vlgmr.msra.gmra.mrb[0].mxu0 %vm354_vm0, %v1100_v2  ;;  %1032 = vmatprep.mubr.msk.bf16.mxu1 %vm354_vm0, %v1103_v4  ;;  %v1102_v7 = vld [vmem:[%s274_s9 + $0x18] sm:$0xff]  }
  0x13   : > { %1028 = vmatprep.mubr.msk.bf16.mxu0 %vm354_vm0, %v1101_v3  ;;  %1033 = vmatmul.mubr.msk.bf16.vlgmr.msra.gmra.mrb[0].mxu1 %vm354_vm0, %v1104_v5  ;;  %v1106_v8 = vld [vmem:[%s274_s9 + $0x38] sm:$0xff]  }
  0x14   : > { %1036 = vmatprep.mubr.msk.bf16.mxu1 %vm354_vm0, %v1105_v6  ;;  %1041 = vmatpush3.bf16.msra.mxu1 %v1107_v9  ;;  %v1111_v6 = vld [vmem:[%s1397_s5] sm:$0xff]   ;;  %v1114_v9 = vld [vmem:[%s1397_s5 + $0x18] sm:$0xff]  }
  0x15   : > { %1042 = vmatprep.subr.bf16.mxu1 %v1108_v10  ;;  %1064 = vmatprep.subr.bf16.mxu0 %v1111_v6 }
  0x16   : > { %1065 = vmatpush3.bf16.msra.mxu0 %v1111_v6 }
  0x18   : > { %1043 = vmatpush3.bf16.msra.mxu1 %v1108_v10  ;;  %v961_v10 = vld [vmem:[%s1396_s4] ss:$0 sm:$0xff] }
  0x19   : > { %1044 = vmatprep.subr.bf16.mxu1 %v1109_v11 }
  0x1a   : > { %1029 = vmatmul.mubr.msk.bf16.gmra.mrb[4].mxu0 %vm354_vm0, %v1102_v7  ;;  %v1112_v7 = vld [vmem:[%s1397_s5 + $0x8] sm:$0xff]  }
  0x1b   : > { %1037 = vmatmul.mubr.msk.bf16.gmra.mrb[4].mxu1 %vm354_vm0, %v1106_v8  ;;  %1066 = vmatprep.subr.bf16.mxu0 %v1112_v7  ;;  %v1113_v8 = vld [vmem:[%s1397_s5 + $0x10] sm:$0xff]  }
  0x1c   : > { %1045 = vmatpush3.bf16.msra.mxu1 %v1109_v11  ;;  %1067 = vmatpush3.bf16.msra.mxu0 %v1112_v7 }
  0x1d   : > { %1046 = vmatprep.subr.bf16.mxu1 %v1110_v12  ;;  %1068 = vmatprep.subr.bf16.mxu0 %v1113_v8 }
  0x20   : > { %1047 = vmatpush3.bf16.msra.mxu1 %v1110_v12  ;;  %1069 = vmatpush3.bf16.msra.mxu0 %v1113_v8 }
  0x21   : > { %1070 = vmatprep.subr.bf16.mxu0 %v1114_v9 }
  0x24   : > { %1071 = vmatpush3.bf16.msra.mxu0 %v1114_v9 }
  0xe5   : > { %v1026_v14 = vpop.f32.mrb[0].mxu0 }
  0xe6   : > { %v422_v15 = vadd.f32 %v1026_v14, %v943_v13  ;;  %v413_v16 = vpop.f32.mrb[1].mxu0  ;;  %v1034_v22 = vpop.f32.mrb[0].mxu1 }
  0xe7   : > { %v414_v17 = vadd.f32 %v943_v13, %v413_v16  ;;  %v1027_v18 = vpop.f32.mrb[2].mxu0  ;;  %v454_v23 = vadd.f32 %v1034_v22, %v943_v13  ;;  %v445_v24 = vpop.f32.mrb[1].mxu1 }
  0xe8   : > { %1115 = vtanh.f32 %v422_v15  ;;  %v425_v19 = vadd.f32 %v1027_v18, %v943_v13  ;;  %v416_v20 = vpop.f32.mrb[3].mxu0  ;;  %v446_v25 = vadd.f32 %v943_v13, %v445_v24  ;;  %v1035_v26 = vpop.f32.mrb[2].mxu1 }
  0xe9   : > { %1117 = vtanh.f32 %v414_v17  ;;  %v417_v21 = vadd.f32 %v943_v13, %v416_v20  ;;  %v457_v27 = vadd.f32 %v1035_v26, %v943_v13  ;;  %v448_v28 = vpop.f32.mrb[3].mxu1 }
  0xea   : > { %1119 = vtanh.f32 %v425_v19  ;;  %v449_v30 = vadd.f32 %v943_v13, %v448_v28 }
  0xeb   : > { %1121 = vtanh.f32 %v417_v21 }
  0xec   : > { %1123 = vtanh.f32 %v454_v23 }
  0xed   : > { %v1030_v29 = vpop.f32.mrb[4].mxu0  ;;  %1125 = vtanh.f32 %v446_v25 }
  0xee   : > { %v438_v31 = vadd.f32 %v1030_v29, %v943_v13  ;;  %v429_v32 = vpop.f32.mrb[5].mxu0  ;;  %1127 = vtanh.f32 %v457_v27  ;;  %v1038_v38 = vpop.f32.mrb[4].mxu1 }
  0xef   : > { %v430_v33 = vadd.f32 %v943_v13, %v429_v32  ;;  %v1031_v34 = vpop.f32.mrb[6].mxu0  ;;  %1129 = vtanh.f32 %v449_v30  ;;  %v470_v40 = vadd.f32 %v1038_v38, %v943_v13  ;;  %v461_v41 = vpop.f32.mrb[5].mxu1 }
  0xf0   : > { %1131 = vtanh.f32 %v438_v31  ;;  %v441_v35 = vadd.f32 %v1031_v34, %v943_v13  ;;  %v432_v36 = vpop.f32.mrb[7].mxu0  ;;  %v462_v43 = vadd.f32 %v943_v13, %v461_v41  ;;  %v1039_v44 = vpop.f32.mrb[6].mxu1 }
  0xf1   : > { %1133 = vtanh.f32 %v430_v33  ;;  %v433_v37 = vadd.f32 %v943_v13, %v432_v36  ;;  %v473_v46 = vadd.f32 %v1039_v44, %v943_v13  ;;  %v464_v47 = vpop.f32.mrb[7].mxu1 }
  0xf2   : > { %v1116_v39 = vpop.eup %1115  ;;  %1135 = vtanh.f32 %v441_v35  ;;  %v465_v50 = vadd.f32 %v943_v13, %v464_v47 }
  0xf3   : > { %v1118_v42 = vpop.eup %1117  ;;  %1137 = vtanh.f32 %v433_v37 }
  0xf4   : > { %v1120_v45 = vpop.eup %1119  ;;  %1139 = vtanh.f32 %v470_v40 }
  0xf5   : > { %v1122_v48 = vpop.eup %1121  ;;  %v493_v49 = vpack.c.bf16 %v1120_v45, %v1116_v39  ;;  %1141 = vtanh.f32 %v462_v43 }
  0xf6   : > { %v1124_v51 = vpop.eup %1123  ;;  %v492_v52 = vpack.c.bf16 %v1122_v48, %v1118_v42  ;;  %1143 = vtanh.f32 %v473_v46 }
  0xf7   : > { %v1126_v53 = vpop.eup %1125  ;;  %1145 = vtanh.f32 %v465_v50 }
  0xf8   : > { %v1128_v54 = vpop.eup %1127  ;;  %1048 = vmatprep.mubr.msk.bf16.mxu1 %vm539_vm1, %v492_v52 }
  0xf9   : > { %v1130_v55 = vpop.eup %1129  ;;  %1049 = vmatmul.mubr.msk.bf16.vlgmr.msra.gmra.mrb[8].mxu1 %vm539_vm1, %v493_v49  ;;  %v497_v56 = vpack.c.bf16 %v1128_v54, %v1124_v51 }
  0xfa   : > { %v1132_v57 = vpop.eup %1131  ;;  %v496_v58 = vpack.c.bf16 %v1130_v55, %v1126_v53 }
  0xfb   : > { %v1134_v59 = vpop.eup %1133 }
  0xfc   : > { %v1136_v60 = vpop.eup %1135 }
  0xfd   : > { %v1138_v61 = vpop.eup %1137  ;;  %v495_v62 = vpack.c.bf16 %v1136_v60, %v1132_v57 }
  0xfe   : > { %v1140_v63 = vpop.eup %1139  ;;  %v494_v0 = vpack.c.bf16 %v1138_v61, %v1134_v59 }
  0xff   : > { %v1142_v1 = vpop.eup %1141 }
 0x100   : > { %v1144_v2 = vpop.eup %1143  ;;  %1052 = vmatprep.mubr.msk.bf16.mxu1 %vm539_vm1, %v494_v0 }
 0x101   : > { %v1146_v3 = vpop.eup %1145  ;;  %1053 = vmatmul.mubr.msk.bf16.gmra.mrb[12].mxu1 %vm539_vm1, %v495_v62  ;;  %v499_v4 = vpack.c.bf16 %v1144_v2, %v1140_v63 }
 0x102   : > { %1056 = vmatprep.mubr.msk.bf16.mxu1 %vm539_vm1, %v496_v58  ;;  %v498_v5 = vpack.c.bf16 %v1146_v3, %v1142_v1  ;;  %v1333_v3 = vld [vmem:[%s1398_s6] ss:$0 sm:$0xff] }
 0x109   : > { %1057 = vmatmul.mubr.msk.bf16.gmra.mrb[16].mxu1 %vm539_vm1, %v497_v56 }
 0x10a   : > { %1060 = vmatprep.mubr.msk.bf16.mxu1 %vm539_vm1, %v498_v5 }
 0x111   : > { %1061 = vmatmul.mubr.msk.bf16.gmra.mrb[20].mxu1 %vm539_vm1, %v499_v4 }
 0x1cc   : > { %v1050_v11 = vpop.f32.mrb[8].mxu1 }
 0x1cd   : > { %v607_v12 = vadd.f32 %v1050_v11, %v961_v10  ;;  %v598_v13 = vpop.f32.mrb[9].mxu1 }
 0x1ce   : > { %v599_v14 = vadd.f32 %v961_v10, %v598_v13  ;;  %v1051_v15 = vpop.f32.mrb[10].mxu1 }
 0x1cf   : > { %1147 = vtanh.f32 %v607_v12  ;;  %v610_v16 = vadd.f32 %v1051_v15, %v961_v10  ;;  %v601_v17 = vpop.f32.mrb[11].mxu1 }
 0x1d0   : > { %1149 = vtanh.f32 %v599_v14  ;;  %v602_v18 = vadd.f32 %v961_v10, %v601_v17 }
 0x1d1   : > { %1151 = vtanh.f32 %v610_v16 }
 0x1d2   : > { %1153 = vtanh.f32 %v602_v18 }
 0x1d4   : > { %v1054_v19 = vpop.f32.mrb[12].mxu1 }
 0x1d5   : > { %v623_v20 = vadd.f32 %v1054_v19, %v961_v10  ;;  %v614_v21 = vpop.f32.mrb[13].mxu1 }
 0x1d6   : > { %v615_v22 = vadd.f32 %v961_v10, %v614_v21  ;;  %v1055_v23 = vpop.f32.mrb[14].mxu1 }
 0x1d7   : > { %1155 = vtanh.f32 %v623_v20  ;;  %v626_v24 = vadd.f32 %v1055_v23, %v961_v10  ;;  %v617_v25 = vpop.f32.mrb[15].mxu1 }
 0x1d8   : > { %1157 = vtanh.f32 %v615_v22  ;;  %v618_v26 = vadd.f32 %v961_v10, %v617_v25 }
 0x1d9   : > { %v1148_v27 = vpop.eup %1147  ;;  %1159 = vtanh.f32 %v626_v24 }
 0x1da   : > { %v1150_v28 = vpop.eup %1149  ;;  %1161 = vtanh.f32 %v618_v26 }
 0x1db   : > { %v1152_v29 = vpop.eup %1151 }
 0x1dc   : > { %v1154_v30 = vpop.eup %1153  ;;  %v678_v31 = vpack.c.bf16 %v1152_v29, %v1148_v27  ;;  %v1058_v32 = vpop.f32.mrb[16].mxu1 }
 0x1dd   : > { %v639_v33 = vadd.f32 %v1058_v32, %v961_v10  ;;  %v630_v34 = vpop.f32.mrb[17].mxu1  ;;  %v677_v35 = vpack.c.bf16 %v1154_v30, %v1150_v28 }
 0x1de   : > { %v631_v36 = vadd.f32 %v961_v10, %v630_v34  ;;  %v1059_v37 = vpop.f32.mrb[18].mxu1 }
 0x1df   : > { %1163 = vtanh.f32 %v639_v33  ;;  %v642_v38 = vadd.f32 %v1059_v37, %v961_v10  ;;  %v633_v39 = vpop.f32.mrb[19].mxu1  ;;  %1072 = vmatprep.mubr.msk.bf16.mxu0 %vm539_vm1, %v677_v35 }
 0x1e0   : > { %1165 = vtanh.f32 %v631_v36  ;;  %v634_v40 = vadd.f32 %v961_v10, %v633_v39  ;;  %1073 = vmatmul.mubr.msk.bf16.vlgmr.msra.gmra.mrb[8].mxu0 %vm539_vm1, %v678_v31 }
 0x1e1   : > { %v1156_v41 = vpop.eup %1155  ;;  %1167 = vtanh.f32 %v642_v38 }
 0x1e2   : > { %v1158_v42 = vpop.eup %1157  ;;  %1169 = vtanh.f32 %v634_v40 }
 0x1e3   : > { %v1160_v43 = vpop.eup %1159 }
 0x1e4   : > { %v1162_v44 = vpop.eup %1161  ;;  %v1062_v45 = vpop.f32.mrb[20].mxu1  ;;  %v680_v46 = vpack.c.bf16 %v1160_v43, %v1156_v41 }
 0x1e5   : > { %v655_v47 = vadd.f32 %v1062_v45, %v961_v10  ;;  %v646_v48 = vpop.f32.mrb[21].mxu1  ;;  %v679_v49 = vpack.c.bf16 %v1162_v44, %v1158_v42 }
 0x1e6   : > { %v647_v50 = vadd.f32 %v961_v10, %v646_v48  ;;  %v1063_v51 = vpop.f32.mrb[22].mxu1 }
 0x1e7   : > { %1171 = vtanh.f32 %v655_v47  ;;  %v658_v52 = vadd.f32 %v1063_v51, %v961_v10  ;;  %v649_v53 = vpop.f32.mrb[23].mxu1  ;;  %1076 = vmatprep.mubr.msk.bf16.mxu0 %vm539_vm1, %v679_v49 }
 0x1e8   : > { %1173 = vtanh.f32 %v647_v50  ;;  %v650_v54 = vadd.f32 %v961_v10, %v649_v53  ;;  %1077 = vmatmul.mubr.msk.bf16.gmra.mrb[12].mxu0 %vm539_vm1, %v680_v46 }
 0x1e9   : > { %v1164_v55 = vpop.eup %1163  ;;  %1175 = vtanh.f32 %v658_v52 }
 0x1ea   : > { %v1166_v56 = vpop.eup %1165  ;;  %1177 = vtanh.f32 %v650_v54 }
 0x1eb   : > { %v1168_v57 = vpop.eup %1167 }
 0x1ec   : > { %v1170_v58 = vpop.eup %1169  ;;  %v682_v59 = vpack.c.bf16 %v1168_v57, %v1164_v55 }
 0x1ed   : > { %v681_v60 = vpack.c.bf16 %v1170_v58, %v1166_v56 }
 0x1ef   : > { %1080 = vmatprep.mubr.msk.bf16.mxu0 %vm539_vm1, %v681_v60 }
 0x1f0   : > { %1081 = vmatmul.mubr.msk.bf16.gmra.mrb[16].mxu0 %vm539_vm1, %v682_v59 }
 0x1f1   : > { %v1172_v61 = vpop.eup %1171 }
 0x1f2   : > { %v1174_v62 = vpop.eup %1173 }
 0x1f3   : > { %v1176_v63 = vpop.eup %1175 }
 0x1f4   : > { %v1178_v0 = vpop.eup %1177  ;;  %v684_v1 = vpack.c.bf16 %v1176_v63, %v1172_v61 }
 0x1f5   : > { %v683_v2 = vpack.c.bf16 %v1178_v0, %v1174_v62 }
 0x1f7   : > { %1084 = vmatprep.mubr.msk.bf16.mxu0 %vm539_vm1, %v683_v2 }
 0x1f8   : > { %1085 = vmatmul.mubr.msk.bf16.gmra.mrb[20].mxu0 %vm539_vm1, %v684_v1 }
 0x2b3   : > { %v1074_v4 = vpop.f32.mrb[8].mxu0 }
 0x2b4   : > { %v791_v5 = vadd.f32 %v1074_v4, %v1333_v3  ;;  %v782_v6 = vpop.f32.mrb[9].mxu0 }
 0x2b5   : > { %v783_v7 = vadd.f32 %v1333_v3, %v782_v6  ;;  %v1075_v8 = vpop.f32.mrb[10].mxu0 }
 0x2b6   : > { %1179 = vtanh.f32 %v791_v5  ;;  %v794_v9 = vadd.f32 %v1075_v8, %v1333_v3  ;;  %v785_v10 = vpop.f32.mrb[11].mxu0 }
 0x2b7   : > { %1181 = vtanh.f32 %v783_v7  ;;  %v786_v11 = vadd.f32 %v1333_v3, %v785_v10 }
 0x2b8   : > { %1183 = vtanh.f32 %v794_v9 }
 0x2b9   : > { %1185 = vtanh.f32 %v786_v11 }
 0x2bb   : > { %v1078_v12 = vpop.f32.mrb[12].mxu0 }
 0x2bc   : > { %v807_v13 = vadd.f32 %v1078_v12, %v1333_v3  ;;  %v798_v14 = vpop.f32.mrb[13].mxu0 }
 0x2bd   : > { %v799_v15 = vadd.f32 %v1333_v3, %v798_v14  ;;  %v1079_v16 = vpop.f32.mrb[14].mxu0 }
 0x2be   : > { %1187 = vtanh.f32 %v807_v13  ;;  %v810_v17 = vadd.f32 %v1079_v16, %v1333_v3  ;;  %v801_v18 = vpop.f32.mrb[15].mxu0 }
 0x2bf   : > { %1189 = vtanh.f32 %v799_v15  ;;  %v802_v19 = vadd.f32 %v1333_v3, %v801_v18 }
 0x2c0   : > { %v1180_v20 = vpop.eup %1179  ;;  %1191 = vtanh.f32 %v810_v17 }
 0x2c1   : > { %v1182_v21 = vpop.eup %1181  ;;  %864 = vst.msk [vmem:[%s1345_s14 + $0x10] sm:$0xff] %vm861_vm2, %v1180_v20  ;;  %1193 = vtanh.f32 %v802_v19 }
 0x2c2   : > { %v1184_v22 = vpop.eup %1183  ;;  %862 = vst.msk [vmem:[%s1345_s14] sm:$0xff] %vm861_vm2, %v1182_v21 }
 0x2c3   : > { %v1186_v23 = vpop.eup %1185  ;;  %865 = vst.msk [vmem:[%s1345_s14 + $0x18] sm:$0xff] %vm861_vm2, %v1184_v22  ;;  %v1082_v24 = vpop.f32.mrb[16].mxu0 }
 0x2c4   : > { %863 = vst.msk [vmem:[%s1345_s14 + $0x8] sm:$0xff] %vm861_vm2, %v1186_v23  ;;  %v823_v25 = vadd.f32 %v1082_v24, %v1333_v3  ;;  %v814_v26 = vpop.f32.mrb[17].mxu0 }
 0x2c5   : > { %v815_v27 = vadd.f32 %v1333_v3, %v814_v26  ;;  %v1083_v28 = vpop.f32.mrb[18].mxu0 }
 0x2c6   : > { %1195 = vtanh.f32 %v823_v25  ;;  %v826_v29 = vadd.f32 %v1083_v28, %v1333_v3  ;;  %v817_v30 = vpop.f32.mrb[19].mxu0 }
 0x2c7   : > { %1197 = vtanh.f32 %v815_v27  ;;  %v818_v31 = vadd.f32 %v1333_v3, %v817_v30 }
 0x2c8   : > { %v1188_v32 = vpop.eup %1187  ;;  %1199 = vtanh.f32 %v826_v29 }
 0x2c9   : > { %v1190_v33 = vpop.eup %1189  ;;  %868 = vst.msk [vmem:[%s1345_s14 + $0x30] sm:$0xff] %vm861_vm2, %v1188_v32  ;;  %1201 = vtanh.f32 %v818_v31 }
 0x2ca   : > { %v1192_v34 = vpop.eup %1191  ;;  %866 = vst.msk [vmem:[%s1345_s14 + $0x20] sm:$0xff] %vm861_vm2, %v1190_v33 }
 0x2cb   : > { %v1194_v35 = vpop.eup %1193  ;;  %869 = vst.msk [vmem:[%s1345_s14 + $0x38] sm:$0xff] %vm861_vm2, %v1192_v34  ;;  %v1086_v36 = vpop.f32.mrb[20].mxu0 }
 0x2cc   : > { %867 = vst.msk [vmem:[%s1345_s14 + $0x28] sm:$0xff] %vm861_vm2, %v1194_v35  ;;  %v839_v37 = vadd.f32 %v1086_v36, %v1333_v3  ;;  %v830_v38 = vpop.f32.mrb[21].mxu0 }
 0x2cd   : > { %v831_v39 = vadd.f32 %v1333_v3, %v830_v38  ;;  %v1087_v40 = vpop.f32.mrb[22].mxu0 }
 0x2ce   : > { %1203 = vtanh.f32 %v839_v37  ;;  %v842_v41 = vadd.f32 %v1087_v40, %v1333_v3  ;;  %v833_v42 = vpop.f32.mrb[23].mxu0 }
 0x2cf   : > { %1205 = vtanh.f32 %v831_v39  ;;  %v834_v43 = vadd.f32 %v1333_v3, %v833_v42 }
 0x2d0   : > { %v1196_v44 = vpop.eup %1195  ;;  %1207 = vtanh.f32 %v842_v41 }
 0x2d1   : > { %v1198_v45 = vpop.eup %1197  ;;  %872 = vst.msk [vmem:[%s1345_s14 + $0x50] sm:$0xff] %vm861_vm2, %v1196_v44  ;;  %1209 = vtanh.f32 %v834_v43 }
 0x2d2   : > { %v1200_v46 = vpop.eup %1199  ;;  %870 = vst.msk [vmem:[%s1345_s14 + $0x40] sm:$0xff] %vm861_vm2, %v1198_v45 }
 0x2d3   : > { %v1202_v47 = vpop.eup %1201  ;;  %873 = vst.msk [vmem:[%s1345_s14 + $0x58] sm:$0xff] %vm861_vm2, %v1200_v46 }
 0x2d4   : > { %871 = vst.msk [vmem:[%s1345_s14 + $0x48] sm:$0xff] %vm861_vm2, %v1202_v47 }
 0x2d8   : > { %v1204_v48 = vpop.eup %1203 }
 0x2d9   : > { %v1206_v49 = vpop.eup %1205  ;;  %876 = vst.msk [vmem:[%s1345_s14 + $0x70] sm:$0xff] %vm861_vm2, %v1204_v48 }
 0x2da   : > { %v1208_v50 = vpop.eup %1207  ;;  %874 = vst.msk [vmem:[%s1345_s14 + $0x60] sm:$0xff] %vm861_vm2, %v1206_v49 }
 0x2db   : > { %v1210_v51 = vpop.eup %1209  ;;  %877 = vst.msk [vmem:[%s1345_s14 + $0x78] sm:$0xff] %vm861_vm2, %v1208_v50 }
 0x2dc   : > { %875 = vst.msk [vmem:[%s1345_s14 + $0x68] sm:$0xff] %vm861_vm2, %v1210_v51 }
 0x2dd PF: > { %s17_s24 = sadd.s32 1, %s1217_s24  }
 0x2de   : > { %p14_p4 = scmp.ge.s32.totalorder %s17_s24, 4  }
 0x2e0   :  { %16 = sbr.rel (!%p14_p4) target bundleno = 1 (0x1), region = 78 }

</bundles_post_ra>
